<compile_context>
chip_gen: v7x
topology: tpu7x:2x2x1
jax: 0.10.0
libtpu: 0.0.40
codegen_flags: <defaults>
</compile_context>

<pallas_src>
import functools

import jax
import jax.numpy as jnp
import numpy as np
from jax.experimental import pallas as pl
from jax.experimental.pallas import tpu as pltpu

LN_EPS = 1e-5

# Row indices inside the packed parameter-vector operand.
_ROW_BIAS1, _ROW_BIAS2 = 0, 1       # [b1 | bcs],  [b2 | bcs2]
_ROW_G1, _ROW_BE1 = 2, 3            # LayerNorm 1 gamma/beta
_ROW_G2, _ROW_BE2 = 4, 5            # LayerNorm 2 gamma/beta
_ROW_WQ, _ROW_BQ = 6, 7             # q-head weight row, q-head bias
_VEC_ROWS = 8                       # exactly one sublane tile


def _round_up(x, m):
    return (x + m - 1) // m * m


def _make_kernel(k1, fc1, fc2):
    """Fused forward kernel. k1 = sublane-aligned layer-1 K (state+action+cs)."""
    two1, two2 = 2 * fc1, 2 * fc2

    def kernel(x_ref, w_ref, vec_ref, out_ref):
        f32 = jnp.float32

        # Packed per-feature vectors: static slices on the Ref (narrow row
        # loads through the load slot; no full-block load + XLU extraction).
        bias1 = vec_ref[_ROW_BIAS1:_ROW_BIAS1 + 1, 0:two1]   # [b1  | bcs ]
        bias2 = vec_ref[_ROW_BIAS2:_ROW_BIAS2 + 1, 0:two2]   # [b2  | bcs2]
        g1 = vec_ref[_ROW_G1:_ROW_G1 + 1, 0:fc1]
        be1 = vec_ref[_ROW_BE1:_ROW_BE1 + 1, 0:fc1]
        g2 = vec_ref[_ROW_G2:_ROW_G2 + 1, 0:fc2]
        be2 = vec_ref[_ROW_BE2:_ROW_BE2 + 1, 0:fc2]
        wq = vec_ref[_ROW_WQ:_ROW_WQ + 1, 0:fc2]
        bq = vec_ref[_ROW_BQ:_ROW_BQ + 1, 0:1]

        # Packed block-diagonal weights: one operand, two static slices.
        w1_bd = w_ref[0:k1, 0:two1]             # blockdiag(w1, wcs)
        w2_bd = w_ref[k1:k1 + two1, 0:two2]     # blockdiag(w2, wcs2)

        def layernorm(v, gamma, beta):
            # Two-pass variance (matches the PyTorch/JAX reference exactly and
            # is numerically safer than E[x^2]-E[x]^2); rsqrt goes to the EUP.
            m = jnp.mean(v, axis=-1, keepdims=True)
            d = v - m
            var = jnp.mean(d * d, axis=-1, keepdims=True)
            return d * jax.lax.rsqrt(var + LN_EPS) * gamma + beta

        # ---- layer 1: [state|action|cs] @ blockdiag(w1, wcs) ----
        h1 = jnp.dot(x_ref[...], w1_bd, preferred_element_type=f32) + bias1
        q = jnp.maximum(h1[:, 0:fc1], 0.0)                        # relu(fc1(sa))
        cs_v = jnp.maximum(layernorm(h1[:, fc1:two1], g1, be1), 0.0)  # relu(bn1(cs(.)))

        # ---- layer 2: [relu(q) | relu(ln(cs))] @ blockdiag(w2, wcs2) ----
        x2 = jnp.concatenate([q, cs_v], axis=-1)
        h2 = jnp.dot(x2, w2_bd, preferred_element_type=f32) + bias2
        cs2 = layernorm(h2[:, fc2:two2], g2, be2)                 # bn2(cs2(.))
        q2 = jnp.maximum(h2[:, 0:fc2] + cs2, 0.0)                 # relu(fc2(q)+cs)

        # ---- q head: VPU multiply + lane reduce (no 1-lane MXU matmul) ----
        out_ref[...] = jnp.sum(q2 * wq, axis=-1, keepdims=True) + bq

    return kernel


def _pack_params(p, state_dim, n_actions, cs_dim):
    """Pack all weights into one block-diagonal operand and all 1-row vectors
    (biases, LN params, q-head row/bias) into one (8, lanes) operand."""
    fc1 = p["g1"].shape[1]
    fc2 = p["g2"].shape[1]
    in1 = state_dim + n_actions
    in_all = in1 + cs_dim
    two1, two2 = 2 * fc1, 2 * fc2
    k1 = _round_up(in_all, 8)
    k2 = _round_up(two1, 8)
    lanes = _round_up(max(two1, two2), 128)

    f32 = jnp.float32
    w = jnp.zeros((k1 + k2, lanes), f32)
    w = w.at[0:in1, 0:fc1].set(p["w1"].astype(f32))
    w = w.at[in1:in_all, fc1:two1].set(p["wcs"].astype(f32))
    w = w.at[k1:k1 + fc1, 0:fc2].set(p["w2"].astype(f32))
    w = w.at[k1 + fc1:k1 + two1, fc2:two2].set(p["wcs2"].astype(f32))

    def row(v, n):
        return jnp.reshape(v.astype(f32), (-1,))[:n]

    vec = jnp.zeros((_VEC_ROWS, lanes), f32)
    vec = vec.at[_ROW_BIAS1, 0:fc1].set(row(p["b1"], fc1))
    vec = vec.at[_ROW_BIAS1, fc1:two1].set(row(p["bcs"], fc1))
    vec = vec.at[_ROW_BIAS2, 0:fc2].set(row(p["b2"], fc2))
    vec = vec.at[_ROW_BIAS2, fc2:two2].set(row(p["bcs2"], fc2))
    vec = vec.at[_ROW_G1, 0:fc1].set(row(p["g1"], fc1))
    vec = vec.at[_ROW_BE1, 0:fc1].set(row(p["be1"], fc1))
    vec = vec.at[_ROW_G2, 0:fc2].set(row(p["g2"], fc2))
    vec = vec.at[_ROW_BE2, 0:fc2].set(row(p["be2"], fc2))
    vec = vec.at[_ROW_WQ, 0:fc2].set(row(p["wq"], fc2))
    vec = vec.at[_ROW_BQ, 0:1].set(row(p["bq"], 1))
    return w, vec


def _default_batch_splits():
    """v7x has 2 TensorCores per chip: give the 'parallel' batch axis >= 2 grid
    steps so both cores get work. Single-TC chips (v5e/v6e) use one step."""
    try:
        kind = jax.devices()[0].device_kind.lower()
        if "v7" in kind or "tpu7" in kind:
            return 2
    except Exception:
        pass
    return 1


@functools.partial(jax.jit, static_argnames=("block_b", "batch_splits"))
def critic_forward(state, cs, action, params, *, block_b=1024, batch_splits=None):
    B = state.shape[0]
    in_all = state.shape[1] + action.shape[1] + cs.shape[1]

    wpack = params["wpack"]
    vec = params["vecpack"]
    fc1 = params["g1"].shape[1]
    fc2 = params["g2"].shape[1]
    two1, two2 = 2 * fc1, 2 * fc2
    k1 = _round_up(in_all, 8)

    # Single activation operand: [state | action | cs], zero-padded on the lane
    # axis to the sublane-aligned layer-1 K (padded wpack rows are zeros).
    pieces = [state, action, cs]
    if k1 > in_all:
        pieces.append(jnp.zeros((B, k1 - in_all), state.dtype))
    x = jnp.concatenate(pieces, axis=1).astype(jnp.float32)

    if batch_splits is None:
        batch_splits = _default_batch_splits()

    # Batch tile: whole batch in one grid step when possible (fixed per-step
    # overhead dominates here); on multi-core chips split across cores.
    if B <= 8:
        tb = B
    else:
        tb = min(block_b, _round_up(pl.cdiv(B, max(batch_splits, 1)), 8))
        if tb >= B:
            tb = B  # full-dim block: one step, no padded rows
    grid = (pl.cdiv(B, tb),)

    # Advisory cost hint so XLA can overlap this tiny custom call.
    flops = 2 * B * (k1 * two1 + two1 * two2 + fc2)
    bytes_accessed = 4 * (B * k1 + int(np.prod(wpack.shape))
                          + int(np.prod(vec.shape)) + B)
    cost = pl.CostEstimate(flops=flops, transcendentals=2 * B,
                           bytes_accessed=bytes_accessed)

    return pl.pallas_call(
        _make_kernel(k1, fc1, fc2),
        out_shape=jax.ShapeDtypeStruct((B, 1), jnp.float32),
        grid=grid,
        in_specs=[
            pl.BlockSpec((tb, k1), lambda i: (i, 0)),        # activations (tiled)
            pl.BlockSpec(wpack.shape, lambda i: (0, 0)),     # packed weights (resident)
            pl.BlockSpec(vec.shape, lambda i: (0, 0)),       # packed vectors (resident)
        ],
        out_specs=pl.BlockSpec((tb, 1), lambda i: (i, 0)),
        compiler_params=pltpu.CompilerParams(
            dimension_semantics=("parallel",)),
        cost_estimate=cost,
    )(x, wpack, vec)


def init_params(key, state_dim, n_actions, fc1_dims, fc2_dims, cs_dim=7):
    """Deterministic init mimicking the PyTorch module's __init__.

    nn.Linear default: U(-1/sqrt(fan_in), 1/sqrt(fan_in)) for W and b.
    cs / cs2 explicitly re-init W and b with U(-1/sqrt(out), 1/sqrt(out)).
    Weights stored transposed [in, out]; the packed kernel operands are also
    built here (wpack = block-diagonal weights, vecpack = 1-row vectors).
    """
    ks = jax.random.split(key, 10)

    def u(k, shape, bound):
        return jax.random.uniform(k, shape, jnp.float32, -bound, bound)

    in1 = state_dim + n_actions
    b_fc1 = 1.0 / np.sqrt(in1)
    b_fc2 = 1.0 / np.sqrt(fc1_dims)
    b_q1 = 1.0 / np.sqrt(fc2_dims)
    b_cs = 1.0 / np.sqrt(fc1_dims)    # normalized_cs  = 1/sqrt(cs.weight.size(0))
    b_cs2 = 1.0 / np.sqrt(fc2_dims)   # normalized_cs2 = 1/sqrt(cs2.weight.size(0))

    params = {
        "w1": u(ks[0], (in1, fc1_dims), b_fc1),
        "b1": u(ks[1], (1, fc1_dims), b_fc1),
        "w2": u(ks[2], (fc1_dims, fc2_dims), b_fc2),
        "b2": u(ks[3], (1, fc2_dims), b_fc2),
        "wq": u(ks[4], (fc2_dims, 1), b_q1),
        "bq": u(ks[5], (1, 1), b_q1),
        "wcs": u(ks[6], (cs_dim, fc1_dims), b_cs),
        "bcs": u(ks[7], (1, fc1_dims), b_cs),
        "g1": jnp.ones((1, fc1_dims), jnp.float32),
        "be1": jnp.zeros((1, fc1_dims), jnp.float32),
        "wcs2": u(ks[8], (fc1_dims, fc2_dims), b_cs2),
        "bcs2": u(ks[9], (1, fc2_dims), b_cs2),
        "g2": jnp.ones((1, fc2_dims), jnp.float32),
        "be2": jnp.zeros((1, fc2_dims), jnp.float32),
    }
    wpack, vecpack = _pack_params(params, state_dim, n_actions, cs_dim)
    params["wpack"] = wpack
    params["vecpack"] = vecpack
    return params


def reference_forward(state, cs, action, p):
    """Pure-JAX reference matching the PyTorch forward, for verification."""

    def ln(x, g, b):
        m = jnp.mean(x, axis=-1, keepdims=True)
        v = jnp.mean((x - m) ** 2, axis=-1, keepdims=True)
        return (x - m) / jnp.sqrt(v + LN_EPS) * g + b

    cs_v = cs @ p["wcs"] + p["bcs"]
    cs_v = jax.nn.relu(ln(cs_v, p["g1"], p["be1"]))
    cs_v = ln(cs_v @ p["wcs2"] + p["bcs2"], p["g2"], p["be2"])
    sa = jnp.concatenate([state, action], axis=1)
    q = jax.nn.relu(sa @ p["w1"] + p["b1"])
    q = q @ p["w2"] + p["b2"]
    q = jax.nn.relu(q + cs_v)
    # q head: identical contraction to `q @ wq + bq`, kept in elementwise f32
    # form so it is independent of the TPU's default (reduced) matmul precision.
    return jnp.sum(q * jnp.reshape(p["wq"], (1, -1)), axis=-1, keepdims=True) + p["bq"]


if __name__ == "__main__":
    # Small shapes implied by the module: state dim 8, 4 actions, cs dim 7,
    # fc1_dims = fc2_dims = 32, batch = 2.
    B, STATE_DIM, N_ACTIONS, CS_DIM = 2, 8, 4, 7
    FC1, FC2 = 32, 32

    key = jax.random.PRNGKey(0)
    kp, ks, kc, ka = jax.random.split(key, 4)

    params = init_params(kp, STATE_DIM, N_ACTIONS, FC1, FC2, cs_dim=CS_DIM)
    state = jax.random.normal(ks, (B, STATE_DIM), jnp.float32)
    cs_in = jax.random.normal(kc, (B, CS_DIM), jnp.float32)
    action = jax.random.normal(ka, (B, N_ACTIONS), jnp.float32)

    q1 = critic_forward(state, cs_in, action, params)
    jax.block_until_ready(q1)
    assert q1.shape == (B, 1)
    np.testing.assert_allclose(
        np.asarray(q1),
        np.asarray(reference_forward(state, cs_in, action, params)),
        rtol=1e-4, atol=1e-4)

    # TD3 replay-batch path: default tiling (single step on v5e/v6e, 2 parallel
    # steps on v7x) plus a forced multi-step / ragged-last-block configuration.
    kb = jax.random.PRNGKey(1)
    kbs, kbc, kba = jax.random.split(kb, 3)
    BB = 300
    state_b = jax.random.normal(kbs, (BB, STATE_DIM), jnp.float32)
    cs_b = jax.random.normal(kbc, (BB, CS_DIM), jnp.float32)
    action_b = jax.random.normal(kba, (BB, N_ACTIONS), jnp.float32)
    ref_b = np.asarray(reference_forward(state_b, cs_b, action_b, params))

    qb = critic_forward(state_b, cs_b, action_b, params)
    jax.block_until_ready(qb)
    np.testing.assert_allclose(np.asarray(qb), ref_b, rtol=1e-4, atol=1e-4)

    qb2 = critic_forward(state_b, cs_b, action_b, params, block_b=128)
    jax.block_until_ready(qb2)
    np.testing.assert_allclose(np.asarray(qb2), ref_b, rtol=1e-4, atol=1e-4)

    print("KERNEL_OK")
</pallas_src>

<mosaic_0001>
module attributes {stable_mosaic.version = 11 : i64} {
  func.func @kernel(%arg0: i32, %arg1: memref<2x24xf32, #tpu.memory_space<vmem>>, %arg2: memref<88x128xf32, #tpu.memory_space<vmem>>, %arg3: memref<8x128xf32, #tpu.memory_space<vmem>>, %arg4: memref<2x1xf32, #tpu.memory_space<vmem>>) attributes {dimension_semantics = [#tpu.dimension_semantics<parallel>], iteration_bounds = array<i64: 1>, scalar_prefetch = 0 : i64, scratch_operands = 0 : i64, tpu.core_type = #tpu.core_type<tc>, window_params = [{transform_indices = @transform_0, window_bounds = array<i64: 2, 24>}, {pipeline_mode = #tpu.pipeline_mode<synchronous>, transform_indices = @transform_1, window_bounds = array<i64: 88, 128>}, {pipeline_mode = #tpu.pipeline_mode<synchronous>, transform_indices = @transform_2, window_bounds = array<i64: 8, 128>}, {transform_indices = @transform_3, window_bounds = array<i64: 2, 1>}]} {
    %c0 = arith.constant 0 : index
    %c0_0 = arith.constant 0 : index
    %0 = vector.load %arg3[%c0, %c0_0] : memref<8x128xf32, #tpu.memory_space<vmem>>, vector<1x64xf32>
    %c1 = arith.constant 1 : index
    %c0_1 = arith.constant 0 : index
    %1 = vector.load %arg3[%c1, %c0_1] : memref<8x128xf32, #tpu.memory_space<vmem>>, vector<1x64xf32>
    %c2 = arith.constant 2 : index
    %c0_2 = arith.constant 0 : index
    %2 = vector.load %arg3[%c2, %c0_2] : memref<8x128xf32, #tpu.memory_space<vmem>>, vector<1x32xf32>
    %c3 = arith.constant 3 : index
    %c0_3 = arith.constant 0 : index
    %3 = vector.load %arg3[%c3, %c0_3] : memref<8x128xf32, #tpu.memory_space<vmem>>, vector<1x32xf32>
    %c4 = arith.constant 4 : index
    %c0_4 = arith.constant 0 : index
    %4 = vector.load %arg3[%c4, %c0_4] : memref<8x128xf32, #tpu.memory_space<vmem>>, vector<1x32xf32>
    %c5 = arith.constant 5 : index
    %c0_5 = arith.constant 0 : index
    %5 = vector.load %arg3[%c5, %c0_5] : memref<8x128xf32, #tpu.memory_space<vmem>>, vector<1x32xf32>
    %c6 = arith.constant 6 : index
    %c0_6 = arith.constant 0 : index
    %6 = vector.load %arg3[%c6, %c0_6] : memref<8x128xf32, #tpu.memory_space<vmem>>, vector<1x32xf32>
    %c7 = arith.constant 7 : index
    %c0_7 = arith.constant 0 : index
    %7 = vector.load %arg3[%c7, %c0_7] : memref<8x128xf32, #tpu.memory_space<vmem>>, vector<1x1xf32>
    %c0_8 = arith.constant 0 : index
    %c0_9 = arith.constant 0 : index
    %8 = vector.load %arg2[%c0_8, %c0_9] : memref<88x128xf32, #tpu.memory_space<vmem>>, vector<24x64xf32>
    %c24 = arith.constant 24 : index
    %c0_10 = arith.constant 0 : index
    %9 = vector.load %arg2[%c24, %c0_10] : memref<88x128xf32, #tpu.memory_space<vmem>>, vector<64x64xf32>
    %c0_11 = arith.constant 0 : index
    %c0_12 = arith.constant 0 : index
    %10 = vector.load %arg1[%c0_11, %c0_12] : memref<2x24xf32, #tpu.memory_space<vmem>>, vector<2x24xf32>
    %cst = arith.constant dense<0.000000e+00> : vector<2x64xf32>
    %11 = tpu.matmul %10, %8, %cst {dimension_numbers = #tpu.dot_dimension_numbers<[1], [0], [0], [1], [0, 0, 1, 1], [], []>} : vector<2x24xf32>, vector<24x64xf32>, vector<2x64xf32> -> vector<2x64xf32>
    %12 = vector.broadcast %0 : vector<1x64xf32> to vector<2x64xf32>
    %13 = arith.addf %11, %12 : vector<2x64xf32>
    %14 = vector.extract_strided_slice %13 {offsets = [0, 0], sizes = [2, 32], strides = [1, 1]} : vector<2x64xf32> to vector<2x32xf32>
    %cst_13 = arith.constant 0.000000e+00 : f32
    %15 = vector.broadcast %cst_13 : f32 to vector<2x32xf32>
    %16 = arith.maximumf %14, %15 : vector<2x32xf32>
    %17 = vector.extract_strided_slice %13 {offsets = [0, 32], sizes = [2, 32], strides = [1, 1]} : vector<2x64xf32> to vector<2x32xf32>
    %cst_14 = arith.constant dense<0.000000e+00> : vector<2xf32>
    %18 = vector.multi_reduction <add>, %17, %cst_14 [1] : vector<2x32xf32> to vector<2xf32>
    %19 = vector.shape_cast %18 : vector<2xf32> to vector<2x1xf32>
    %cst_15 = arith.constant 3.200000e+01 : f32
    %20 = vector.broadcast %cst_15 : f32 to vector<2x1xf32>
    %21 = arith.divf %19, %20 : vector<2x1xf32>
    %22 = vector.broadcast %21 : vector<2x1xf32> to vector<2x32xf32>
    %23 = arith.subf %17, %22 : vector<2x32xf32>
    %24 = arith.mulf %23, %23 : vector<2x32xf32>
    %cst_16 = arith.constant dense<0.000000e+00> : vector<2xf32>
    %25 = vector.multi_reduction <add>, %24, %cst_16 [1] : vector<2x32xf32> to vector<2xf32>
    %26 = vector.shape_cast %25 : vector<2xf32> to vector<2x1xf32>
    %cst_17 = arith.constant 3.200000e+01 : f32
    %27 = vector.broadcast %cst_17 : f32 to vector<2x1xf32>
    %28 = arith.divf %26, %27 : vector<2x1xf32>
    %cst_18 = arith.constant 9.99999974E-6 : f32
    %29 = vector.broadcast %cst_18 : f32 to vector<2x1xf32>
    %30 = arith.addf %28, %29 : vector<2x1xf32>
    %31 = math.rsqrt %30 : vector<2x1xf32>
    %32 = vector.broadcast %31 : vector<2x1xf32> to vector<2x32xf32>
    %33 = arith.mulf %23, %32 : vector<2x32xf32>
    %34 = vector.broadcast %2 : vector<1x32xf32> to vector<2x32xf32>
    %35 = arith.mulf %33, %34 : vector<2x32xf32>
    %36 = vector.broadcast %3 : vector<1x32xf32> to vector<2x32xf32>
    %37 = arith.addf %35, %36 : vector<2x32xf32>
    %cst_19 = arith.constant 0.000000e+00 : f32
    %38 = vector.broadcast %cst_19 : f32 to vector<2x32xf32>
    %39 = arith.maximumf %37, %38 : vector<2x32xf32>
    %40 = tpu.concatenate %16, %39 in 1 : vector<2x32xf32>, vector<2x32xf32> -> vector<2x64xf32>
    %cst_20 = arith.constant dense<0.000000e+00> : vector<2x64xf32>
    %41 = tpu.matmul %40, %9, %cst_20 {dimension_numbers = #tpu.dot_dimension_numbers<[1], [0], [0], [1], [0, 0, 1, 1], [], []>} : vector<2x64xf32>, vector<64x64xf32>, vector<2x64xf32> -> vector<2x64xf32>
    %42 = vector.broadcast %1 : vector<1x64xf32> to vector<2x64xf32>
    %43 = arith.addf %41, %42 : vector<2x64xf32>
    %44 = vector.extract_strided_slice %43 {offsets = [0, 32], sizes = [2, 32], strides = [1, 1]} : vector<2x64xf32> to vector<2x32xf32>
    %cst_21 = arith.constant dense<0.000000e+00> : vector<2xf32>
    %45 = vector.multi_reduction <add>, %44, %cst_21 [1] : vector<2x32xf32> to vector<2xf32>
    %46 = vector.shape_cast %45 : vector<2xf32> to vector<2x1xf32>
    %cst_22 = arith.constant 3.200000e+01 : f32
    %47 = vector.broadcast %cst_22 : f32 to vector<2x1xf32>
    %48 = arith.divf %46, %47 : vector<2x1xf32>
    %49 = vector.broadcast %48 : vector<2x1xf32> to vector<2x32xf32>
    %50 = arith.subf %44, %49 : vector<2x32xf32>
    %51 = arith.mulf %50, %50 : vector<2x32xf32>
    %cst_23 = arith.constant dense<0.000000e+00> : vector<2xf32>
    %52 = vector.multi_reduction <add>, %51, %cst_23 [1] : vector<2x32xf32> to vector<2xf32>
    %53 = vector.shape_cast %52 : vector<2xf32> to vector<2x1xf32>
    %cst_24 = arith.constant 3.200000e+01 : f32
    %54 = vector.broadcast %cst_24 : f32 to vector<2x1xf32>
    %55 = arith.divf %53, %54 : vector<2x1xf32>
    %cst_25 = arith.constant 9.99999974E-6 : f32
    %56 = vector.broadcast %cst_25 : f32 to vector<2x1xf32>
    %57 = arith.addf %55, %56 : vector<2x1xf32>
    %58 = math.rsqrt %57 : vector<2x1xf32>
    %59 = vector.broadcast %58 : vector<2x1xf32> to vector<2x32xf32>
    %60 = arith.mulf %50, %59 : vector<2x32xf32>
    %61 = vector.broadcast %4 : vector<1x32xf32> to vector<2x32xf32>
    %62 = arith.mulf %60, %61 : vector<2x32xf32>
    %63 = vector.broadcast %5 : vector<1x32xf32> to vector<2x32xf32>
    %64 = arith.addf %62, %63 : vector<2x32xf32>
    %65 = vector.extract_strided_slice %43 {offsets = [0, 0], sizes = [2, 32], strides = [1, 1]} : vector<2x64xf32> to vector<2x32xf32>
    %66 = arith.addf %65, %64 : vector<2x32xf32>
    %cst_26 = arith.constant 0.000000e+00 : f32
    %67 = vector.broadcast %cst_26 : f32 to vector<2x32xf32>
    %68 = arith.maximumf %66, %67 : vector<2x32xf32>
    %69 = vector.broadcast %6 : vector<1x32xf32> to vector<2x32xf32>
    %70 = arith.mulf %68, %69 : vector<2x32xf32>
    %cst_27 = arith.constant dense<0.000000e+00> : vector<2xf32>
    %71 = vector.multi_reduction <add>, %70, %cst_27 [1] : vector<2x32xf32> to vector<2xf32>
    %72 = vector.shape_cast %71 : vector<2xf32> to vector<2x1xf32>
    %73 = vector.broadcast %7 : vector<1x1xf32> to vector<2x1xf32>
    %74 = arith.addf %72, %73 : vector<2x1xf32>
    %c0_28 = arith.constant 0 : index
    %c0_29 = arith.constant 0 : index
    %75 = vector.load %arg4[%c0_28, %c0_29] : memref<2x1xf32, #tpu.memory_space<vmem>>, vector<2x1xf32>
    tpu.vector_store %arg4[%c0_28, %c0_29], %74 {strides = array<i32>} : memref<2x1xf32, #tpu.memory_space<vmem>>, vector<2x1xf32>,
    return
  }
  func.func @transform_0(%arg0: i32) -> (i32, i32) {
    %c0_i32 = arith.constant 0 : i32
    %c0_i32_0 = arith.constant 0 : i32
    return %arg0, %c0_i32 : i32, i32
  }
  func.func @transform_1(%arg0: i32) -> (i32, i32) {
    %c0_i32 = arith.constant 0 : i32
    %c0_i32_0 = arith.constant 0 : i32
    %c0_i32_1 = arith.constant 0 : i32
    return %c0_i32, %c0_i32_0 : i32, i32
  }
  func.func @transform_2(%arg0: i32) -> (i32, i32) {
    %c0_i32 = arith.constant 0 : i32
    %c0_i32_0 = arith.constant 0 : i32
    %c0_i32_1 = arith.constant 0 : i32
    return %c0_i32, %c0_i32_0 : i32, i32
  }
  func.func @transform_3(%arg0: i32) -> (i32, i32) {
    %c0_i32 = arith.constant 0 : i32
    %c0_i32_0 = arith.constant 0 : i32
    return %arg0, %c0_i32 : i32, i32
  }
}

</mosaic_0001>

<bundles_post_ra>
// kernel: critic_forward.1
= control target key start
LH: loop header
LB: loop body
LE: loop exit
PB: predicated region body
PF: predicated region fallthrough
CT: control target
= control target key end

     0   :  { %8 = vsyncpa [#allocation3], 0  ;;  %s416_s12 = smov [#allocation2]   ;;  %s500_s0 = inlined_call_operand.vmem [shape: f32[2,24], index: 0, kind: input, shape index: {}]   ;;  %s501_s1 = inlined_call_operand.hbm [shape: f32[88,128], index: 1, kind: input, shape index: {}]   ;;  %s502_s2 = inlined_call_operand.vmem [shape: f32[8,128], index: 2, kind: input, shape index: {}]   ;;  %s503_s3 = inlined_call_operand.vmem [shape: f32[2,1], index: 3, kind: output, shape index: {}]  }
   0x1   :  { %s16_s13 = sshll.u32 %s416_s12, 4  ;;  %s392_s16 = scalar_lea.hbm %s501_s1, 1408  ;;  %s17_s13 = int_to_ptr.vmem [resolvable:$true] %s16_s13 }
   0x2   :  { %p393_p0 = scmp.ne.s32.totalorder %s501_s1, %s392_s16  ;;  %p396_p1 = scmp.lt.u32.totalorder %s392_s16, %s501_s1 }
   0x4   :  { %p398_p2 = pnand %p396_p1, %p393_p0 }
   0x6   :  { %401 = shalt.err (!%p398_p2)
}
   0x7   :  { %s402_s21 = scalar_lea.vmem %s17_s13, 1408  ;;  %p407_p4 = scmp.lt.s32.totalorder %s17_s13, %s17_s13 }
   0x8   :  { %p403_p3 = scmp.ne.s32.totalorder %s17_s13, %s402_s21  ;;  %p408_p5 = scmp.lt.s32.totalorder %s402_s21, %s402_s21 }
   0xa   :  { %p409_p6 = por %p408_p5, %p407_p4 }
   0xc   :  { %p410_p7 = pnand %p409_p6, %p403_p3 }
   0xe   :  { %413 = shalt.err (!%p410_p7)
}
   0xf   :  { %s417_s22 = smov 128   ;;  %s418_s23 = smov 8  }
  0x10   :  { %22 = dma.hbm_to_vmem [thread:$0]  %s501_s1, 1408, %s17_s13, [#allocation3], %s417_s22, %s417_s22, %s418_s23  }
  0x11   :  { %414 = dma.done.wait [#allocation3], 1408  }
  0x12   :  { %415 = vsyncadd [#allocation3], 4294965888  ;;  %v419_v0 = vmov 0.0|0.0   ;;  %vm420_vm0 = vmmov 0   ;;  %v421_v1 = vmov 0.0   ;;  %v36_v2 = vld [vmem:[#allocation2] sm:$0xff] }
  0x13   :  { %365 = vmatprep.subr.bf16.mxu0 %v419_v0  ;;  %343 = vmatprep.mubr.msk.f32.mxu0 %vm420_vm0, %v421_v1  ;;  %v37_v3 = vld [vmem:[#allocation2 + $0x8] sm:$0xff]  ;;  %v38_v5 = vld [vmem:[#allocation2 + $0x10] sm:$0xff]  ;;  %v47_v6 = vld [vmem:[%s500_s0] sm:$0x3]  ;;  %vm52_vm1 = vcmask 195584   ;;  %s422_s29 = smov 96  }
  0x14   :  { %368 = vmatprep.subr.bf16.mxu1 %v419_v0  ;;  %362 = vmatprep.mubr.msk.f32.mxu1 %vm420_vm0, %v421_v1  ;;  %v366_v4 = vpack.c.bf16 %v37_v3, %v36_v2  ;;  %v314_v7 = vld [vmem:[%s502_s2] ss:$0 sm:$0xff]  ;;  %vm131_vm2 = vcmask 254976   ;;  %v316_v13 = vld [vmem:[%s502_s2 + $0x2] ss:$0 sm:$0xff]  ;;  %s423_s4 = smov 32  }
  0x15   :  { %v317_v20 = vld [vmem:[%s502_s2 + $0x3] ss:$0 sm:$0xff]  ;;  %v39_v21 = vld [vmem:[#allocation2 + $0x18] sm:$0xff]  ;;  %v41_v23 = vld [vmem:[#allocation2 + $0x28] sm:$0xff]  ;;  %vm169_vm3 = vcmask 261120   ;;  %vm175_vm4 = vcmask 523264  }
  0x16   :  { %367 = vmatpush3.bf16.msra.mxu0 %v366_v4  ;;  %v40_v22 = vld [vmem:[#allocation2 + $0x20] sm:$0xff]  ;;  %v42_v25 = vld [vmem:[#allocation2 + $0x30] sm:$0xff]  ;;  %v43_v27 = vld [vmem:[#allocation2 + $0x38] sm:$0xff]  ;;  %vm307_vm5 = vcmask 1024  }
  0x17   :  { %341 = vmatprep.subr.mxu0 %v421_v1  ;;  %v369_v24 = vpack.c.bf16 %v40_v22, %v39_v21  ;;  %v372_v26 = vpack.c.bf16 %v42_v25, %v41_v23  ;;  %v44_v28 = vld [vmem:[#allocation2 + $0x40] sm:$0xff]  ;;  %v45_v30 = vld [vmem:[#allocation2 + $0x48] sm:$0xff]  ;;  %v46_v31 = vld [vmem:[#allocation2 + $0x50] sm:$0xff] }
  0x18   :  { %v375_v29 = vpack.c.bf16 %v44_v28, %v43_v27  ;;  %v378_v32 = vpack.c.bf16 %v46_v31, %v45_v30  ;;  %v318_v45 = vld [vmem:[%s502_s2 + $0x1] ss:$0 sm:$0xff]  ;;  %v320_v51 = vld [vmem:[%s502_s2 + $0x4] ss:$0 sm:$0xff]  ;;  %v321_v58 = vld [vmem:[%s502_s2 + $0x5] ss:$0 sm:$0xff] }
  0x19   :  { %370 = vmatpush3.bf16.msra.mxu1 %v369_v24 }
  0x1a   :  { %342 = vmatpush3.msra.mxu0 %v38_v5  ;;  %371 = vmatprep.subr.bf16.mxu1 %v419_v0 }
  0x1b   :  { %344 = vmatmul.mubr.msk.f32.vlgmr.msra.gmra.mrb[0].mxu0 %vm52_vm1, %v47_v6  ;;  %v322_v6 = vld [vmem:[%s502_s2 + $0x6] ss:$0 sm:$0xff] }
  0x1d   :  { %373 = vmatpush3.bf16.msra.mxu1 %v372_v26 }
  0x1e   :  { %374 = vmatprep.subr.bf16.mxu1 %v419_v0 }
  0x21   :  { %376 = vmatpush3.bf16.msra.mxu1 %v375_v29 }
  0x22   :  { %377 = vmatprep.subr.bf16.mxu1 %v419_v0 }
  0x25   :  { %379 = vmatpush3.bf16.msra.mxu1 %v378_v32 }
  0xee   :  { %v122_v8 = vpop.f32.mrb[0].mxu0 }
  0xef   :  { %v123_v9 = vadd.f32 %v314_v7, %v122_v8  ;;  %v345_v10 = vpop.f32.mrb[1].mxu0 }
  0xf0   :  { %v323_v10 = vld [vmem:[%s502_s2 + $0x7] ss:$0 sm:$0xff] }
  0xf1   :  { %128 = vrot.lane.b32.xlu0 %v123_v9, %s422_s29  ;;  %v126_v42 = vmax.f32 %v123_v9, 0.0 }
 0x163   :  { %v129_v11 = vpop.permute.xlu0 %128 }
 0x164   :  { %v132_v12 = vsel %vm131_vm2, %v129_v11, 0.0 }
 0x165   :  { %133 = vadd.xlane.f32.xlu0 %v132_v12 }
 0x17b   :  { %155 = vrot.lane.b32.xlu0 %v316_v13, %s423_s4 }
 0x1f2   :  { %v134_v14 = vpop.xlane.xlu0 %133 }
 0x1f3   :  { %v136_v15 = vmul.f32 0.03125, %v134_v14 }
 0x1f5   :  { %v137_v16 = vsub.f32 %v123_v9, %v136_v15 }
 0x1f6   :  { %v156_v37 = vpop.permute.xlu0 %155 }
 0x1f7   :  { %v138_v17 = vmul.f32 %v137_v16, %v137_v16 }
 0x1f9   :  { %140 = vrot.lane.b32.xlu1 %v138_v17, %s422_s29 }
 0x26b   :  { %v141_v18 = vpop.permute.xlu1 %140 }
 0x26c   :  { %v143_v19 = vsel %vm131_vm2, %v141_v18, 0.0 }
 0x26d   :  { %144 = vadd.xlane.f32.xlu1 %v143_v19 }
 0x27e   :  { %164 = vrot.lane.b32.xlu1 %v317_v20, %s423_s4 }
 0x2fa   :  { %v145_v33 = vpop.xlane.xlu1 %144 }
 0x2fb   :  { %v146_v34 = vmul.f32 0.03125, %v145_v33 }
 0x2fd   :  { %v147_v35 = vadd.f32 1e-05, %v146_v34 }
 0x2fe   :  { %v165_v39 = vpop.permute.xlu1 %164 }
 0x2ff   :  { %388 = vrsqrt.f32 %v147_v35 }
 0x309   :  { %v389_v36 = vpop.eup %388 }
 0x30a   :  { %v149_v38 = vmul.f32 %v389_v36, %v137_v16 }
 0x30c   :  { %v158_v40 = vmul.f32 %v156_v37, %v149_v38 }
 0x30e   :  { %v167_v41 = vadd.f32 %v165_v39, %v158_v40 }
 0x310   :  { %v168_v43 = vmax.f32 %v167_v41, 0.0 }
 0x312   :  { %v170_v44 = vsel %vm169_vm3, %v126_v42, %v168_v43 }
 0x313   :  { %363 = vmatmul.mubr.msk.f32.vlgmr.msra.gmra.mrb[0].mxu1 %vm175_vm4, %v170_v44 }
 0x3e6   :  { %v245_v46 = vpop.f32.mrb[0].mxu1 }
 0x3e7   :  { %v246_v47 = vadd.f32 %v318_v45, %v245_v46  ;;  %v364_v48 = vpop.f32.mrb[1].mxu1 }
 0x3e9   :  { %250 = vrot.lane.b32.xlu0 %v246_v47, %s422_s29 }
 0x45b   :  { %v251_v49 = vpop.permute.xlu0 %250 }
 0x45c   :  { %v253_v50 = vsel %vm131_vm2, %v251_v49, 0.0 }
 0x45d   :  { %254 = vadd.xlane.f32.xlu1 %v253_v50 }
 0x46e   :  { %275 = vrot.lane.b32.xlu1 %v320_v51, %s423_s4 }
 0x4ea   :  { %v255_v52 = vpop.xlane.xlu1 %254 }
 0x4eb   :  { %v256_v53 = vmul.f32 0.03125, %v255_v52 }
 0x4ed   :  { %v257_v54 = vsub.f32 %v246_v47, %v256_v53 }
 0x4ee   :  { %v276_v63 = vpop.permute.xlu1 %275 }
 0x4ef   :  { %v258_v55 = vmul.f32 %v257_v54, %v257_v54 }
 0x4f1   :  { %260 = vrot.lane.b32.xlu0 %v258_v55, %s422_s29 }
 0x563   :  { %v261_v56 = vpop.permute.xlu0 %260 }
 0x564   :  { %v263_v57 = vsel %vm131_vm2, %v261_v56, 0.0 }
 0x565   :  { %264 = vadd.xlane.f32.xlu0 %v263_v57 }
 0x57b   :  { %284 = vrot.lane.b32.xlu0 %v321_v58, %s423_s4 }
 0x5f2   :  { %v265_v59 = vpop.xlane.xlu0 %264 }
 0x5f3   :  { %v266_v60 = vmul.f32 0.03125, %v265_v59 }
 0x5f5   :  { %v267_v61 = vadd.f32 1e-05, %v266_v60 }
 0x5f6   :  { %v285_v1 = vpop.permute.xlu0 %284 }
 0x5f7   :  { %390 = vrsqrt.f32 %v267_v61 }
 0x601   :  { %v391_v62 = vpop.eup %390 }
 0x602   :  { %v269_v0 = vmul.f32 %v391_v62, %v257_v54 }
 0x604   :  { %v278_v2 = vmul.f32 %v276_v63, %v269_v0 }
 0x606   :  { %v287_v3 = vadd.f32 %v285_v1, %v278_v2 }
 0x608   :  { %289 = vrot.lane.b32.xlu1 %v287_v3, %s422_s29 }
 0x67a   :  { %v290_v4 = vpop.permute.xlu1 %289 }
 0x67b   :  { %v292_v5 = vadd.f32 %v290_v4, %v246_v47 }
 0x67d   :  { %v293_v7 = vmax.f32 %v292_v5, 0.0 }
 0x67f   :  { %v298_v8 = vmul.f32 %v322_v6, %v293_v7 }
 0x681   :  { %v299_v9 = vsel %vm131_vm2, %v298_v8, 0.0 }
 0x682   :  { %300 = vadd.xlane.f32.xlu1 %v299_v9 }
 0x70f   :  { %v301_v11 = vpop.xlane.xlu1 %300 }
 0x710   :  { %v306_v12 = vadd.f32 %v323_v10, %v301_v11 }
 0x712   :  { %308 = vst.msk [vmem:[%s503_s3] sm:$0x3] %vm307_vm5, %v306_v12 }
 0x713   :  { %313 = vsyncpa [#allocation3], 1 }

</bundles_post_ra>
